<compile_context>
chip_gen: v5e
topology: v5e:2x2
jax: 0.10.0
libtpu: 0.0.40
codegen_flags: <defaults>
</compile_context>

<pallas_src>
from typing import NamedTuple, Any

import jax
import jax.numpy as jnp
from jax.experimental import pallas as pl
from jax.experimental.pallas import tpu as pltpu


_LANE = 128        # lane width: all feature dims padded to a multiple of this
_ROW_ALIGN = 32    # row-tile alignment (covers f32/bf16 sublane packing)


def _round_up(x, m):
    return ((x + m - 1) // m) * m


def _default_vmem_limit():
    """Scoped-VMEM limit: ~3/4 of physical VMEM, capped at 100 MiB.

    128 MiB parts (v5e / v6e) -> 96 MiB; 64 MiB parts (v7x) -> 48 MiB.
    Falls back to the conservative 48 MiB if the chip cannot be queried.
    """
    try:
        phys = pltpu.get_tpu_info().vmem_capacity_bytes
    except Exception:           # unknown chip / query unsupported -> be conservative
        phys = 64 * 1024 * 1024
    return min(int(phys * 3 // 4), 100 * 1024 * 1024)


# --------------------------------------------------------------------------- #
# Kernel
# --------------------------------------------------------------------------- #
def _ffn_kernel(x_ref, w1_ref, b1_ref, w2_ref, b2_ref, o_ref, h_ref, acc_ref):
    """One (tm, tn) output tile of  relu(X @ W1^T + b1) @ W2^T + b2.

    Grid = (row tiles i, output-column tiles j, hidden tiles k), k innermost.
      * j == 0     : compute hidden tile  h_k = relu(X @ W1^T[:, k] + b1[k])
                     once per row tile and stash it in VMEM scratch; it is
                     reused for every output-column tile j.
      * k == 0     : zero the f32 output accumulator.
      * every step : acc += h_k @ W2^T[k, j]   (f32 accumulation on the MXU).
      * k == last  : add bias, cast, lane-dense store of the output tile.
    """
    j = pl.program_id(1)
    k = pl.program_id(2)

    @pl.when(j == 0)
    def _():
        h = jnp.dot(x_ref[...], w1_ref[...], preferred_element_type=jnp.float32)
        # bias + ReLU in f32: free VPU filler under the MXU (v5e has no bf16 VALU)
        h = jnp.maximum(h + b1_ref[...], 0.0)
        h_ref[k] = h.astype(h_ref.dtype)

    @pl.when(k == 0)
    def _():
        acc_ref[...] = jnp.zeros_like(acc_ref)

    acc_ref[...] += jnp.dot(h_ref[k], w2_ref[...],
                            preferred_element_type=jnp.float32)

    @pl.when(k == pl.num_programs(2) - 1)
    def _():
        o_ref[...] = (acc_ref[...] + b2_ref[...]).astype(o_ref.dtype)


# --------------------------------------------------------------------------- #
# One-time parameter preparation (hoisted out of the forward pass)
# --------------------------------------------------------------------------- #
class FFNParams(NamedTuple):
    w1_t: jax.Array      # (d_in_p, hid_p)   pre-transposed, padded, MXU dtype
    b1: jax.Array        # (1, hid_p)        f32
    w2_t: jax.Array      # (hid_p, d_out_p)  pre-transposed, padded, MXU dtype
    b2: jax.Array        # (1, d_out_p)      f32
    d_in: int
    d_out: int
    d_in_p: int
    hid_p: int
    d_out_p: int
    tk: int              # hidden tile
    tn: int              # output-column tile
    tm_max: int          # row-tile upper bound the VMEM budget was derived for
    compute_dtype: Any
    out_dtype: Any       # None -> use x.dtype
    vmem_limit: int


def _select_col_tiles(d_in_p, hid_p, d_out_p, tm, in_isz, out_isz, budget):
    """Pick (tk, tn) against the VMEM budget.

    Preference: W1 & W2 fully resident (constant block index => single HBM
    fetch per call) -> stream W2 column tiles (once per row tile) -> tile the
    hidden dim too.  Returns None if nothing fits at this tm.
    """
    def fits(tk, tn):
        hid_pp = _round_up(hid_p, tk)
        need = (2 * tm * d_in_p * in_isz        # X block      (double-buffered)
                + 2 * d_in_p * tk * in_isz      # W1^T block   (double-buffered)
                + 2 * tk * 4                    # b1 block (f32)
                + 2 * tk * tn * in_isz          # W2^T block   (double-buffered)
                + 2 * tn * 4                    # b2 block (f32)
                + 2 * tm * tn * out_isz         # output block (double-buffered)
                + tm * hid_pp * in_isz          # h scratch (whole hidden)
                + tm * tn * 4)                  # f32 accumulator scratch
        return need <= budget

    tk_ladder = [hid_p] + [t for t in (4096, 2048, 1024, 512, 256, 128) if t < hid_p]
    tn_ladder = [d_out_p] + [t for t in (4096, 2048, 1024, 512, 256, 128) if t < d_out_p]
    for tk in tk_ladder:
        for tn in tn_ladder:
            if fits(tk, tn):
                return tk, tn
    return None


def prepare_ffn_params(w1, b1, w2, b2, *, compute_dtype=jnp.bfloat16,
                       out_dtype=None, tm_target=512, vmem_limit=None):
    """One-time weight layout: transpose to (in, out), cast to the MXU dtype,
    zero-pad every feature dim to a lane multiple, and pick tiles against the
    chip's VMEM budget.  Call once at parameter-load time."""
    hidden, d_in = w1.shape
    d_out, hidden2 = w2.shape
    assert hidden2 == hidden and b1.shape == (hidden,) and b2.shape == (d_out,)

    if vmem_limit is None:
        vmem_limit = _default_vmem_limit()
    budget = int(vmem_limit * 0.9)          # headroom for Mosaic internal scratch

    d_in_p = _round_up(d_in, _LANE)
    hid_p = _round_up(hidden, _LANE)
    d_out_p = _round_up(d_out, _LANE)

    in_isz = jnp.dtype(compute_dtype).itemsize
    out_isz = 4 if out_dtype is None else jnp.dtype(out_dtype).itemsize

    # Row-tile target; shrink only if even minimal column tiles don't fit.
    tm = max(_ROW_ALIGN, _round_up(min(tm_target, 2048), _ROW_ALIGN))
    sel = _select_col_tiles(d_in_p, hid_p, d_out_p, tm, in_isz, out_isz, budget)
    while sel is None and tm > _ROW_ALIGN:
        tm = max(_ROW_ALIGN, tm // 2)
        sel = _select_col_tiles(d_in_p, hid_p, d_out_p, tm, in_isz, out_isz, budget)
    if sel is None:
        # TODO(synk): also tile d_in (K of the first matmul) for pathologically
        # wide inputs; fall back to minimal column tiles until then.
        sel = (128, 128)
    tk, tn = sel

    hid_pp = _round_up(hid_p, tk)
    d_out_pp = _round_up(d_out_p, tn)

    # Pre-transposed, padded, cast weights (zero padding is mathematically inert).
    w1_t = jnp.pad(w1.T.astype(compute_dtype),
                   ((0, d_in_p - d_in), (0, hid_pp - hidden)))
    w2_t = jnp.pad(w2.T.astype(compute_dtype),
                   ((0, hid_pp - hidden), (0, d_out_pp - d_out)))
    b1_p = jnp.pad(b1.astype(jnp.float32)[None, :], ((0, 0), (0, hid_pp - hidden)))
    b2_p = jnp.pad(b2.astype(jnp.float32)[None, :], ((0, 0), (0, d_out_pp - d_out)))

    return FFNParams(w1_t=w1_t, b1=b1_p, w2_t=w2_t, b2=b2_p,
                     d_in=d_in, d_out=d_out,
                     d_in_p=d_in_p, hid_p=hid_pp, d_out_p=d_out_pp,
                     tk=tk, tn=tn, tm_max=tm,
                     compute_dtype=compute_dtype, out_dtype=out_dtype,
                     vmem_limit=vmem_limit)


# --------------------------------------------------------------------------- #
# Forward pass
# --------------------------------------------------------------------------- #
def position_wise_ffn_apply(x, p: FFNParams):
    """x: (..., d_in) -> (..., d_out).  Weights must come from prepare_ffn_params."""
    batch_shape = x.shape[:-1]
    d_in = x.shape[-1]
    assert d_in == p.d_in
    M = 1
    for s in batch_shape:
        M *= s

    out_dtype = x.dtype if p.out_dtype is None else p.out_dtype
    in_isz = jnp.dtype(p.compute_dtype).itemsize

    # ---- row tiling ---------------------------------------------------------
    # Large row tile keeps the streamed-W2 path MXU-bound; clamp for small M and
    # split into >= 2 row tiles (when there are enough rows) so the 'parallel'
    # axis can shard across v7x's two TensorCores.
    M_al = _round_up(M, _ROW_ALIGN)
    tm = min(p.tm_max, M_al)
    if M_al // tm < 2 and M_al >= 2 * _ROW_ALIGN:
        tm = _round_up(max(_ROW_ALIGN, M_al // 2), _ROW_ALIGN)
    M_p = _round_up(M, tm)
    n_rows = M_p // tm

    nj = p.d_out_p // p.tn
    nk = p.hid_p // p.tk
    grid = (n_rows, nj, nk)

    # Only X is padded per call (weights were prepared once).
    x2 = jnp.pad(x.reshape(M, d_in).astype(p.compute_dtype),
                 ((0, M_p - M), (0, p.d_in_p - d_in)))

    # W1/b1 are only consumed at j == 0; pin their block index for j > 0 so the
    # pipeline does not re-stream them across the output-column axis.
    def w1_map(i, j, k):
        return (0, jnp.where(j == 0, k, 0))

    def b1_map(i, j, k):
        return (0, jnp.where(j == 0, k, 0))

    # ---- cost estimate reflecting actual HBM traffic ------------------------
    w1_passes = 1 if nk == 1 else n_rows
    w2_passes = 1 if (nj == 1 and nk == 1) else n_rows
    cost = pl.CostEstimate(
        flops=2 * M_p * (p.d_in_p * p.hid_p + p.hid_p * p.d_out_p),
        transcendentals=0,
        bytes_accessed=(x2.size * in_isz
                        + p.w1_t.size * in_isz * w1_passes
                        + p.w2_t.size * in_isz * w2_passes
                        + p.b1.size * 4 * w1_passes
                        + p.b2.size * 4 * w2_passes
                        + M_p * p.d_out_p * jnp.dtype(out_dtype).itemsize))

    out = pl.pallas_call(
        _ffn_kernel,
        out_shape=jax.ShapeDtypeStruct((M_p, p.d_out_p), out_dtype),
        grid_spec=pltpu.PrefetchScalarGridSpec(
            num_scalar_prefetch=0,
            grid=grid,
            in_specs=[
                pl.BlockSpec((tm, p.d_in_p), lambda i, j, k: (i, 0)),    # X rows
                pl.BlockSpec((p.d_in_p, p.tk), w1_map),                  # W1^T k-tile
                pl.BlockSpec((1, p.tk), b1_map),                         # b1 k-tile
                pl.BlockSpec((p.tk, p.tn), lambda i, j, k: (k, j)),      # W2^T tile
                pl.BlockSpec((1, p.tn), lambda i, j, k: (0, j)),         # b2 tile
            ],
            out_specs=pl.BlockSpec((tm, p.tn), lambda i, j, k: (i, j)),
            scratch_shapes=[
                pltpu.VMEM((nk, tm, p.tk), p.compute_dtype),   # hidden activation
                pltpu.VMEM((tm, p.tn), jnp.float32),           # f32 accumulator
            ],
        ),
        compiler_params=pltpu.CompilerParams(
            dimension_semantics=("parallel", "arbitrary", "arbitrary"),
            vmem_limit_bytes=p.vmem_limit),
        cost_estimate=cost,
    )(x2, p.w1_t, p.b1, p.w2_t, p.b2)

    return out[:M, :p.d_out].reshape(*batch_shape, p.d_out)


def position_wise_ffn(x, w1, b1, w2, b2, *, compute_dtype=jnp.bfloat16, **kw):
    """Convenience one-shot wrapper (prefer prepare_ffn_params + apply in loops)."""
    return position_wise_ffn_apply(
        x, prepare_ffn_params(w1, b1, w2, b2, compute_dtype=compute_dtype, **kw))


# --------------------------------------------------------------------------- #
# Demo / correctness check
# --------------------------------------------------------------------------- #
if __name__ == "__main__":
    # Small shapes consistent with the module's forward.
    batch, seq = 2, 8
    ffn_num_input, ffn_num_hiddens, ffn_num_output = 32, 64, 32

    key = jax.random.PRNGKey(0)
    kx, kw1, kb1, kw2, kb2 = jax.random.split(key, 5)

    x = jax.random.normal(kx, (batch, seq, ffn_num_input), dtype=jnp.float32)

    # PyTorch-style uniform(-1/sqrt(fan_in), 1/sqrt(fan_in)) init, deterministic.
    lim1 = 1.0 / (ffn_num_input ** 0.5)
    w1 = jax.random.uniform(kw1, (ffn_num_hiddens, ffn_num_input),
                            minval=-lim1, maxval=lim1, dtype=jnp.float32)
    b1 = jax.random.uniform(kb1, (ffn_num_hiddens,),
                            minval=-lim1, maxval=lim1, dtype=jnp.float32)
    lim2 = 1.0 / (ffn_num_hiddens ** 0.5)
    w2 = jax.random.uniform(kw2, (ffn_num_output, ffn_num_hiddens),
                            minval=-lim2, maxval=lim2, dtype=jnp.float32)
    b2 = jax.random.uniform(kb2, (ffn_num_output,),
                            minval=-lim2, maxval=lim2, dtype=jnp.float32)

    # Reference in plain JAX (same math as the PyTorch forward).
    ref = jnp.maximum(x @ w1.T + b1, 0.0) @ w2.T + b2

    # Parameter prep is hoisted: done once, reused for every forward call.
    params_f32 = prepare_ffn_params(w1, b1, w2, b2, compute_dtype=jnp.float32)
    params_bf16 = prepare_ffn_params(w1, b1, w2, b2, compute_dtype=jnp.bfloat16)

    # 1) Exact-dtype path: f32 operands, f32 accumulation -> tight check.
    y_f32 = jax.block_until_ready(position_wise_ffn_apply(x, params_f32))
    assert y_f32.shape == (batch, seq, ffn_num_output)
    assert jnp.allclose(y_f32, ref, atol=1e-5, rtol=1e-5)

    # 2) Fast MXU path: bf16 operands, f32 accumulation -> loose check.
    y_bf16 = jax.block_until_ready(position_wise_ffn_apply(x, params_bf16))
    assert y_bf16.shape == (batch, seq, ffn_num_output)
    assert jnp.allclose(y_bf16, ref, atol=1e-1, rtol=1e-1)

    print("KERNEL_OK")
</pallas_src>

<mosaic_0001>
module attributes {stable_mosaic.version = 11 : i64} {
  func.func @_ffn_kernel(%arg0: i32, %arg1: i32, %arg2: i32, %arg3: memref<32x128xf32, #tpu.memory_space<vmem>>, %arg4: memref<128x128xf32, #tpu.memory_space<vmem>>, %arg5: memref<1x128xf32, #tpu.memory_space<vmem>>, %arg6: memref<128x128xf32, #tpu.memory_space<vmem>>, %arg7: memref<1x128xf32, #tpu.memory_space<vmem>>, %arg8: memref<32x128xf32, #tpu.memory_space<vmem>>, %arg9: memref<1x32x128xf32, #tpu.memory_space<vmem>>, %arg10: memref<32x128xf32, #tpu.memory_space<vmem>>) attributes {dimension_semantics = [#tpu.dimension_semantics<parallel>, #tpu.dimension_semantics<arbitrary>, #tpu.dimension_semantics<arbitrary>], iteration_bounds = array<i64: 1, 1, 1>, scalar_prefetch = 0 : i64, scratch_operands = 2 : i64, tpu.core_type = #tpu.core_type<tc>, window_params = [{transform_indices = @transform_0, window_bounds = array<i64: 32, 128>}, {transform_indices = @transform_1, window_bounds = array<i64: 128, 128>}, {transform_indices = @transform_2, window_bounds = array<i64: 1, 128>}, {transform_indices = @transform_3, window_bounds = array<i64: 128, 128>}, {transform_indices = @transform_4, window_bounds = array<i64: 1, 128>}, {transform_indices = @transform_5, window_bounds = array<i64: 32, 128>}]} {
    %c0_i32 = arith.constant 0 : i32
    %0 = arith.cmpi eq, %arg1, %c0_i32 : i32
    %1 = arith.extui %0 : i1 to i32
    %c0_i32_0 = arith.constant 0 : i32
    %2 = arith.cmpi ne, %1, %c0_i32_0 : i32
    scf.if %2 {
      %c0_12 = arith.constant 0 : index
      %c0_13 = arith.constant 0 : index
      %17 = vector.load %arg3[%c0_12, %c0_13] : memref<32x128xf32, #tpu.memory_space<vmem>>, vector<32x128xf32>
      %c0_14 = arith.constant 0 : index
      %c0_15 = arith.constant 0 : index
      %18 = vector.load %arg4[%c0_14, %c0_15] : memref<128x128xf32, #tpu.memory_space<vmem>>, vector<128x128xf32>
      %cst_16 = arith.constant dense<0.000000e+00> : vector<32x128xf32>
      %19 = tpu.matmul %17, %18, %cst_16 {dimension_numbers = #tpu.dot_dimension_numbers<[1], [0], [0], [1], [0, 0, 1, 1], [], []>} : vector<32x128xf32>, vector<128x128xf32>, vector<32x128xf32> -> vector<32x128xf32>
      %c0_17 = arith.constant 0 : index
      %c0_18 = arith.constant 0 : index
      %20 = vector.load %arg5[%c0_17, %c0_18] : memref<1x128xf32, #tpu.memory_space<vmem>>, vector<1x128xf32>
      %21 = vector.broadcast %20 : vector<1x128xf32> to vector<32x128xf32>
      %22 = arith.addf %19, %21 : vector<32x128xf32>
      %cst_19 = arith.constant 0.000000e+00 : f32
      %23 = vector.broadcast %cst_19 : f32 to vector<32x128xf32>
      %24 = arith.maximumf %22, %23 : vector<32x128xf32>
      %25 = arith.index_cast %arg2 : i32 to index
      %c0_20 = arith.constant 0 : index
      %c0_21 = arith.constant 0 : index
      %26 = vector.load %arg9[%25, %c0_20, %c0_21] : memref<1x32x128xf32, #tpu.memory_space<vmem>>, vector<1x32x128xf32>
      %27 = vector.shape_cast %26 : vector<1x32x128xf32> to vector<32x128xf32>
      %28 = vector.shape_cast %24 : vector<32x128xf32> to vector<1x32x128xf32>
      tpu.vector_store %arg9[%25, %c0_20, %c0_21], %28 {strides = array<i32>} : memref<1x32x128xf32, #tpu.memory_space<vmem>>, vector<1x32x128xf32>,
    } else {
    }
    %c0_i32_1 = arith.constant 0 : i32
    %3 = arith.cmpi eq, %arg2, %c0_i32_1 : i32
    %4 = arith.extui %3 : i1 to i32
    %c0_i32_2 = arith.constant 0 : i32
    %5 = arith.cmpi ne, %4, %c0_i32_2 : i32
    scf.if %5 {
      %cst_12 = arith.constant 0.000000e+00 : f32
      %17 = vector.broadcast %cst_12 : f32 to vector<32x128xf32>
      %c0_13 = arith.constant 0 : index
      %c0_14 = arith.constant 0 : index
      %18 = vector.load %arg10[%c0_13, %c0_14] : memref<32x128xf32, #tpu.memory_space<vmem>>, vector<32x128xf32>
      tpu.vector_store %arg10[%c0_13, %c0_14], %17 {strides = array<i32>} : memref<32x128xf32, #tpu.memory_space<vmem>>, vector<32x128xf32>,
    } else {
    }
    %c0 = arith.constant 0 : index
    %c0_3 = arith.constant 0 : index
    %6 = vector.load %arg10[%c0, %c0_3] : memref<32x128xf32, #tpu.memory_space<vmem>>, vector<32x128xf32>
    %7 = arith.index_cast %arg2 : i32 to index
    %c0_4 = arith.constant 0 : index
    %c0_5 = arith.constant 0 : index
    %8 = vector.load %arg9[%7, %c0_4, %c0_5] : memref<1x32x128xf32, #tpu.memory_space<vmem>>, vector<1x32x128xf32>
    %9 = vector.shape_cast %8 : vector<1x32x128xf32> to vector<32x128xf32>
    %c0_6 = arith.constant 0 : index
    %c0_7 = arith.constant 0 : index
    %10 = vector.load %arg6[%c0_6, %c0_7] : memref<128x128xf32, #tpu.memory_space<vmem>>, vector<128x128xf32>
    %cst = arith.constant dense<0.000000e+00> : vector<32x128xf32>
    %11 = tpu.matmul %9, %10, %cst {dimension_numbers = #tpu.dot_dimension_numbers<[1], [0], [0], [1], [0, 0, 1, 1], [], []>} : vector<32x128xf32>, vector<128x128xf32>, vector<32x128xf32> -> vector<32x128xf32>
    %12 = arith.addf %6, %11 : vector<32x128xf32>
    %c0_8 = arith.constant 0 : index
    %c0_9 = arith.constant 0 : index
    %13 = vector.load %arg10[%c0_8, %c0_9] : memref<32x128xf32, #tpu.memory_space<vmem>>, vector<32x128xf32>
    tpu.vector_store %arg10[%c0_8, %c0_9], %12 {strides = array<i32>} : memref<32x128xf32, #tpu.memory_space<vmem>>, vector<32x128xf32>,
    %c0_i32_10 = arith.constant 0 : i32
    %14 = arith.cmpi eq, %arg2, %c0_i32_10 : i32
    %15 = arith.extui %14 : i1 to i32
    %c0_i32_11 = arith.constant 0 : i32
    %16 = arith.cmpi ne, %15, %c0_i32_11 : i32
    scf.if %16 {
      %c0_12 = arith.constant 0 : index
      %c0_13 = arith.constant 0 : index
      %17 = vector.load %arg10[%c0_12, %c0_13] : memref<32x128xf32, #tpu.memory_space<vmem>>, vector<32x128xf32>
      %c0_14 = arith.constant 0 : index
      %c0_15 = arith.constant 0 : index
      %18 = vector.load %arg7[%c0_14, %c0_15] : memref<1x128xf32, #tpu.memory_space<vmem>>, vector<1x128xf32>
      %19 = vector.broadcast %18 : vector<1x128xf32> to vector<32x128xf32>
      %20 = arith.addf %17, %19 : vector<32x128xf32>
      %c0_16 = arith.constant 0 : index
      %c0_17 = arith.constant 0 : index
      %21 = vector.load %arg8[%c0_16, %c0_17] : memref<32x128xf32, #tpu.memory_space<vmem>>, vector<32x128xf32>
      tpu.vector_store %arg8[%c0_16, %c0_17], %20 {strides = array<i32>} : memref<32x128xf32, #tpu.memory_space<vmem>>, vector<32x128xf32>,
    } else {
    }
    return
  }
  func.func @transform_0(%arg0: i32, %arg1: i32, %arg2: i32) -> (i32, i32) {
    %c0_i32 = arith.constant 0 : i32
    %c0_i32_0 = arith.constant 0 : i32
    return %arg0, %c0_i32 : i32, i32
  }
  func.func @transform_1(%arg0: i32, %arg1: i32, %arg2: i32) -> (i32, i32) {
    %c0_i32 = arith.constant 0 : i32
    %0 = arith.cmpi eq, %arg1, %c0_i32 : i32
    %c0_i32_0 = arith.constant 0 : i32
    %1 = arith.select %0, %arg2, %c0_i32_0 : i32
    %c0_i32_1 = arith.constant 0 : i32
    %c0_i32_2 = arith.constant 0 : i32
    return %c0_i32_1, %1 : i32, i32
  }
  func.func @transform_2(%arg0: i32, %arg1: i32, %arg2: i32) -> (i32, i32) {
    %c0_i32 = arith.constant 0 : i32
    %0 = arith.cmpi eq, %arg1, %c0_i32 : i32
    %c0_i32_0 = arith.constant 0 : i32
    %1 = arith.select %0, %arg2, %c0_i32_0 : i32
    %c0_i32_1 = arith.constant 0 : i32
    %c0_i32_2 = arith.constant 0 : i32
    return %c0_i32_1, %1 : i32, i32
  }
  func.func @transform_3(%arg0: i32, %arg1: i32, %arg2: i32) -> (i32, i32) {
    %c0_i32 = arith.constant 0 : i32
    return %arg2, %arg1 : i32, i32
  }
  func.func @transform_4(%arg0: i32, %arg1: i32, %arg2: i32) -> (i32, i32) {
    %c0_i32 = arith.constant 0 : i32
    %c0_i32_0 = arith.constant 0 : i32
    return %c0_i32, %arg1 : i32, i32
  }
  func.func @transform_5(%arg0: i32, %arg1: i32, %arg2: i32) -> (i32, i32) {
    %c0_i32 = arith.constant 0 : i32
    return %arg0, %arg1 : i32, i32
  }
}

</mosaic_0001>

<bundles_post_ra>
// kernel: tpu_custom_call.1
= control target key start
LH: loop header
LB: loop body
LE: loop exit
PB: predicated region body
PF: predicated region fallthrough
CT: control target
= control target key end

     0   :  { %10 = vsyncpa [#allocation5], 0  ;;  %s483_s0 = inlined_call_operand.hbm [shape: f32[32,128], index: 0, kind: input, shape index: {}]   ;;  %s484_s1 = inlined_call_operand.hbm [shape: f32[128,128], index: 1, kind: input, shape index: {}]   ;;  %s485_s2 = inlined_call_operand.vmem [shape: f32[1,128], index: 2, kind: input, shape index: {}]   ;;  %s486_s3 = inlined_call_operand.hbm [shape: f32[128,128], index: 3, kind: input, shape index: {}]   ;;  %s487_s4 = inlined_call_operand.vmem [shape: f32[1,128], index: 4, kind: input, shape index: {}]   ;;  %s488_s5 = inlined_call_operand.hbm [shape: f32[32,128], index: 5, kind: output, shape index: {}]  }
   0x1   :  { %11 = vsyncpa [#allocation8], 0 }
   0x2   :  { %12 = vsyncpa [#allocation6], 0  ;;  %s34_s20 = sshll.u32 %s484_s1, 4  ;;  %s417_s21 = smov [#allocation7]   ;;  %s35_s20 = int_to_ptr.hbm [resolvable:$true] %s34_s20 }
   0x3   :  { %s36_s22 = sshll.u32 %s417_s21, 4  ;;  %s17_s25 = sshll.u32 %s483_s0, 4  ;;  %s37_s22 = int_to_ptr.vmem [resolvable:$true] %s36_s22  ;;  %s18_s25 = int_to_ptr.hbm [resolvable:$true] %s17_s25 }
   0x4   :  { %s418_s26 = smov 128   ;;  %s419_s27 = smov 8  }
   0x5   :  { %42 = dma.hbm_to_vmem [thread:$0]  %s35_s20, 2048, %s37_s22, [#allocation8], %s418_s26, %s418_s26, %s419_s27  }
   0x6   :  { %s420_s28 = smov [#allocation4]   ;;  %s56_s1 = sshll.u32 %s486_s3, 4  ;;  %s57_s1 = int_to_ptr.hbm [resolvable:$true] %s56_s1 }
   0x7   :  { %s19_s29 = sshll.u32 %s420_s28, 4  ;;  %s421_s0 = smov [#allocation9]   ;;  %s20_s29 = int_to_ptr.vmem [resolvable:$true] %s19_s29 }
   0x8   :  { %25 = dma.hbm_to_vmem [thread:$0]  %s18_s25, 512, %s20_s29, [#allocation5], %s418_s26, %s418_s26, %s419_s27  }
   0x9   :  { %s58_s7 = sshll.u32 %s421_s0, 4  ;;  %s59_s7 = int_to_ptr.vmem [resolvable:$true] %s58_s7 }
   0xa   :  { %64 = dma.hbm_to_vmem [thread:$0]  %s57_s1, 2048, %s59_s7, [#allocation8], %s418_s26, %s418_s26, %s419_s27  }
   0xb   :  { %411 = dma.done.wait [#allocation5], 512  }
   0xc   :  { %412 = vsyncadd [#allocation5], 4294966784 }
   0xd   :  { %413 = dma.done.wait [#allocation8], 4096  }
   0xe   :  { %414 = vsyncadd [#allocation8], 4294963200  ;;  %v116_v0 = vld [vmem:[#allocation7 + $0x78] sm:$0xff]  ;;  %v115_v1 = vld [vmem:[#allocation7 + $0x70] sm:$0xff]  ;;  %s256_s14 = sshll.u32 %s488_s5, 4  ;;  %s257_s14 = int_to_ptr.hbm [resolvable:$true] %s256_s14 }
   0xf   :  { %275 = vmatpush.msra.mxu2 %v116_v0  ;;  %121 = vmatpush.msra.mxu0 %v116_v0  ;;  %v114_v2 = vld [vmem:[#allocation7 + $0x68] sm:$0xff]  ;;  %v113_v3 = vld [vmem:[#allocation7 + $0x60] sm:$0xff]  ;;  %v112_v4 = vld [vmem:[#allocation7 + $0x58] sm:$0xff] }
  0x10   :  { %v111_v5 = vld [vmem:[#allocation7 + $0x50] sm:$0xff]  ;;  %v193_v6 = vld [vmem:[#allocation9 + $0x78] sm:$0xff]  ;;  %v110_v8 = vld [vmem:[#allocation7 + $0x48] sm:$0xff] }
  0x11   :  { %276 = vmatpush.msra.mxu2 %v115_v1  ;;  %122 = vmatpush.msra.mxu0 %v115_v1  ;;  %v192_v7 = vld [vmem:[#allocation9 + $0x70] sm:$0xff]  ;;  %v191_v9 = vld [vmem:[#allocation9 + $0x68] sm:$0xff]  ;;  %v109_v10 = vld [vmem:[#allocation7 + $0x40] sm:$0xff] }
  0x12   :  { %291 = vmatpush.msra.mxu3 %v193_v6  ;;  %194 = vmatpush.msra.mxu1 %v193_v6  ;;  %v190_v11 = vld [vmem:[#allocation9 + $0x60] sm:$0xff]  ;;  %v108_v12 = vld [vmem:[#allocation7 + $0x38] sm:$0xff]  ;;  %v107_v14 = vld [vmem:[#allocation7 + $0x30] sm:$0xff] }
  0x13   :  { %277 = vmatpush.msra.mxu2 %v114_v2  ;;  %123 = vmatpush.msra.mxu0 %v114_v2  ;;  %v189_v13 = vld [vmem:[#allocation9 + $0x58] sm:$0xff]  ;;  %v188_v15 = vld [vmem:[#allocation9 + $0x50] sm:$0xff]  ;;  %v106_v16 = vld [vmem:[#allocation7 + $0x28] sm:$0xff] }
  0x14   :  { %292 = vmatpush.msra.mxu3 %v192_v7  ;;  %195 = vmatpush.msra.mxu1 %v192_v7  ;;  %v187_v17 = vld [vmem:[#allocation9 + $0x48] sm:$0xff]  ;;  %v105_v18 = vld [vmem:[#allocation7 + $0x20] sm:$0xff]  ;;  %v104_v20 = vld [vmem:[#allocation7 + $0x18] sm:$0xff] }
  0x15   :  { %278 = vmatpush.msra.mxu2 %v113_v3  ;;  %124 = vmatpush.msra.mxu0 %v113_v3  ;;  %v186_v19 = vld [vmem:[#allocation9 + $0x40] sm:$0xff]  ;;  %v185_v21 = vld [vmem:[#allocation9 + $0x38] sm:$0xff]  ;;  %v103_v22 = vld [vmem:[#allocation7 + $0x10] sm:$0xff] }
  0x16   :  { %293 = vmatpush.msra.mxu3 %v191_v9  ;;  %196 = vmatpush.msra.mxu1 %v191_v9  ;;  %v184_v23 = vld [vmem:[#allocation9 + $0x30] sm:$0xff]  ;;  %v102_v24 = vld [vmem:[#allocation7 + $0x8] sm:$0xff]  ;;  %v101_v26 = vld [vmem:[#allocation7] sm:$0xff] }
  0x17   :  { %279 = vmatpush.msra.mxu2 %v112_v4  ;;  %125 = vmatpush.msra.mxu0 %v112_v4  ;;  %v183_v25 = vld [vmem:[#allocation9 + $0x28] sm:$0xff]  ;;  %v99_v27 = vld [vmem:[#allocation4 + $0x10] sm:$0xff]  ;;  %v97_v28 = vld [vmem:[#allocation4] sm:$0xff] }
  0x18   :  { %294 = vmatpush.msra.mxu3 %v190_v11  ;;  %197 = vmatpush.msra.mxu1 %v190_v11  ;;  %v182_v29 = vld [vmem:[#allocation9 + $0x20] sm:$0xff]  ;;  %v181_v30 = vld [vmem:[#allocation9 + $0x18] sm:$0xff]  ;;  %v98_v32 = vld [vmem:[#allocation4 + $0x8] sm:$0xff] }
  0x19   :  { %280 = vmatpush.msra.mxu2 %v111_v5  ;;  %126 = vmatpush.msra.mxu0 %v111_v5  ;;  %v100_v31 = vld [vmem:[#allocation4 + $0x18] sm:$0xff]  ;;  %v180_v33 = vld [vmem:[#allocation9 + $0x10] sm:$0xff]  ;;  %v179_v34 = vld [vmem:[#allocation9 + $0x8] sm:$0xff] }
  0x1a   :  { %295 = vmatpush.msra.mxu3 %v189_v13  ;;  %198 = vmatpush.msra.mxu1 %v189_v13  ;;  %v178_v35 = vld [vmem:[#allocation9] sm:$0xff] }
  0x1b   :  { %281 = vmatpush.msra.mxu2 %v110_v8  ;;  %127 = vmatpush.msra.mxu0 %v110_v8  ;;  %v313_v36 = vld [vmem:[%s485_s2] ss:$0 sm:$0xff]  ;;  %s422_s2 = smov [#allocation10]  }
  0x1c   :  { %296 = vmatpush.msra.mxu3 %v188_v15  ;;  %199 = vmatpush.msra.mxu1 %v188_v15  ;;  %v314_v49 = vld [vmem:[%s487_s4] ss:$0 sm:$0xff]  ;;  %s254_s11 = sshll.u32 %s422_s2, 4  ;;  %s255_s11 = int_to_ptr.vmem [resolvable:$true] %s254_s11 }
  0x1d   :  { %282 = vmatpush.msra.mxu2 %v109_v10  ;;  %128 = vmatpush.msra.mxu0 %v109_v10 }
  0x1e   :  { %297 = vmatpush.msra.mxu3 %v187_v17  ;;  %200 = vmatpush.msra.mxu1 %v187_v17 }
  0x1f   :  { %283 = vmatpush.msra.mxu2 %v108_v12  ;;  %129 = vmatpush.msra.mxu0 %v108_v12 }
  0x20   :  { %298 = vmatpush.msra.mxu3 %v186_v19  ;;  %201 = vmatpush.msra.mxu1 %v186_v19 }
  0x21   :  { %284 = vmatpush.msra.mxu2 %v107_v14  ;;  %130 = vmatpush.msra.mxu0 %v107_v14 }
  0x22   :  { %299 = vmatpush.msra.mxu3 %v185_v21  ;;  %202 = vmatpush.msra.mxu1 %v185_v21 }
  0x23   :  { %285 = vmatpush.msra.mxu2 %v106_v16  ;;  %131 = vmatpush.msra.mxu0 %v106_v16 }
  0x24   :  { %300 = vmatpush.msra.mxu3 %v184_v23  ;;  %203 = vmatpush.msra.mxu1 %v184_v23 }
  0x25   :  { %286 = vmatpush.msra.mxu2 %v105_v18  ;;  %132 = vmatpush.msra.mxu0 %v105_v18 }
  0x26   :  { %301 = vmatpush.msra.mxu3 %v183_v25  ;;  %204 = vmatpush.msra.mxu1 %v183_v25 }
  0x27   :  { %287 = vmatpush.msra.mxu2 %v104_v20  ;;  %133 = vmatpush.msra.mxu0 %v104_v20 }
  0x28   :  { %302 = vmatpush.msra.mxu3 %v182_v29  ;;  %205 = vmatpush.msra.mxu1 %v182_v29 }
  0x29   :  { %288 = vmatpush.msra.mxu2 %v103_v22  ;;  %134 = vmatpush.msra.mxu0 %v103_v22 }
  0x2a   :  { %303 = vmatpush.msra.mxu3 %v181_v30  ;;  %206 = vmatpush.msra.mxu1 %v181_v30 }
  0x2b   :  { %289 = vmatpush.msra.mxu2 %v102_v24  ;;  %135 = vmatpush.msra.mxu0 %v102_v24 }
  0x2c   :  { %304 = vmatpush.msra.mxu3 %v180_v33  ;;  %207 = vmatpush.msra.mxu1 %v180_v33 }
  0x2d   :  { %290 = vmatpush.msra.mxu2 %v101_v26  ;;  %136 = vmatpush.msra.mxu0 %v101_v26 }
  0x2e   :  { %143 = vmatmul.f32.vlgmr.msra.gmra.mxu2 %v99_v27  ;;  %137 = vmatmul.f32.vlgmr.msra.gmra.mxu0 %v97_v28 }
  0x2f   :  { %305 = vmatpush.msra.mxu3 %v179_v34  ;;  %208 = vmatpush.msra.mxu1 %v179_v34 }
  0x31   :  { %306 = vmatpush.msra.mxu3 %v178_v35  ;;  %209 = vmatpush.msra.mxu1 %v178_v35 }
  0x36   :  { %146 = vmatmul.f32.gmra.mxu2 %v100_v31  ;;  %140 = vmatmul.f32.gmra.mxu0 %v98_v32 }
  0xab   :  { %v138_v37 = vpop.f32.mrf.mxu0 }
  0xac   :  { %v139_v38 = vadd.f32 %v313_v36, %v138_v37 }
  0xae   :  { %v150_v39 = vmax.f32 %v139_v38, 0.0 }
  0xb0   :  { %210 = vmatmul.f32.vlgmr.msra.gmra.mxu1 %v150_v39 }
  0xb1   :  { %v144_v40 = vpop.f32.mrf.mxu2 }
  0xb2   :  { %v145_v41 = vadd.f32 %v313_v36, %v144_v40 }
  0xb3   :  { %v141_v42 = vpop.f32.mrf.mxu0 }
  0xb4   :  { %v152_v43 = vmax.f32 %v145_v41, 0.0  ;;  %v142_v44 = vadd.f32 %v313_v36, %v141_v42 }
  0xb6   :  { %216 = vmatmul.f32.vlgmr.msra.gmra.mxu3 %v152_v43  ;;  %v151_v45 = vmax.f32 %v142_v44, 0.0 }
  0xb8   :  { %213 = vmatmul.f32.gmra.mxu1 %v151_v45 }
  0xb9   :  { %v147_v46 = vpop.f32.mrf.mxu2 }
  0xba   :  { %v148_v47 = vadd.f32 %v313_v36, %v147_v46 }
  0xbc   :  { %v153_v48 = vmax.f32 %v148_v47, 0.0 }
  0xbe   :  { %219 = vmatmul.f32.gmra.mxu3 %v153_v48 }
 0x12d   :  { %v211_v50 = vpop.f32.mrf.mxu1 }
 0x12e   :  { %v242_v51 = vadd.f32 %v314_v49, %v211_v50 }
 0x130   :  { %246 = vst [vmem:[#allocation10] sm:$0xff] %v242_v51 }
 0x135   :  { %v214_v52 = vpop.f32.mrf.mxu1 }
 0x136   :  { %v243_v53 = vadd.f32 %v314_v49, %v214_v52 }
 0x138   :  { %247 = vst [vmem:[#allocation10 + $0x8] sm:$0xff] %v243_v53 }
 0x139   :  { %v217_v54 = vpop.f32.mrf.mxu3 }
 0x13a   :  { %v244_v55 = vadd.f32 %v314_v49, %v217_v54 }
 0x13c   :  { %248 = vst [vmem:[#allocation10 + $0x10] sm:$0xff] %v244_v55 }
 0x141   :  { %v220_v56 = vpop.f32.mrf.mxu3 }
 0x142   :  { %v245_v57 = vadd.f32 %v314_v49, %v220_v56 }
 0x144   :  { %249 = vst [vmem:[#allocation10 + $0x18] sm:$0xff] %v245_v57 }
 0x145   :  { %262 = dma.vmem_to_hbm [thread:$0]  %s255_s11, 512, %s257_s14, [#allocation6], %s418_s26, %s418_s26, %s419_s27  }
 0x146   :  { %415 = dma.done.wait [#allocation6], 512  }
 0x147   :  { %416 = vsyncadd [#allocation6], 4294966784 }
 0x148   :  { %267 = vsyncpa [#allocation5], 1 }
 0x149   :  { %268 = vsyncpa [#allocation8], 1 }
 0x14a   :  { %269 = vsyncpa [#allocation6], 1 }

</bundles_post_ra>
